<compile_context>
chip_gen: v6e
topology: v6e:2x2x1
jax: 0.10.0
libtpu: 0.0.40
codegen_flags: <defaults>
</compile_context>

<pallas_src>
import math

import jax
import jax.numpy as jnp
from jax.experimental import pallas as pl
from jax.experimental.pallas import tpu as pltpu


def _sigmoid(z):
    # sigmoid(z) = 0.5 * (tanh(z/2) + 1): single EUP op, no f32 divide on VALU.
    return 0.5 * (jnp.tanh(0.5 * z) + 1.0)


def _ham_kernel(x_ref, w1t_ref, w2_ref, a_cat_ref, cb_ref, o_ref):
    """One batch-block of images per grid step.

    x_ref / o_ref : (Bb, C, HW) f32 VMEM blocks (lane-dense HW).
    w1t_ref       : (C, Cr)  = W1^T       (channel MLP, layer 1)
    w2_ref        : (C, Cr)  = W2         (channel MLP, layer 2)
    a_cat_ref     : (2*HW, HW) fused Toeplitz matrix for the 7x7 conv applied
                    to [avg_map ; max_map].
    cb_ref        : (1,) f32 in SMEM  -- spatial-conv bias.
    """
    bb = x_ref.shape[0]
    w1t = w1t_ref[...]                                            # (C, Cr)
    w2 = w2_ref[...]                                              # (C, Cr)

    am_rows = []
    for b in range(bb):                     # static unroll over the batch block
        x = x_ref[b]                                              # (C, HW)

        # ---- Channel attention (tiny MLP: VPU broadcast-multiply-reduce) ----
        mean_c = jnp.mean(x, axis=1, keepdims=True)               # (C, 1)
        h = jnp.sum(w1t * mean_c, axis=0, keepdims=True)          # (1, Cr)
        h = jnp.maximum(h, 0.0)
        ca = _sigmoid(jnp.sum(w2 * h, axis=1, keepdims=True))     # (C, 1)
        xc = x * ca                                               # (C, HW)

        # Stash the channel-scaled map in the output block; re-scaled below.
        o_ref[b] = xc.astype(o_ref.dtype)

        # ---- Spatial attention inputs: channel-avg / channel-max rows ----
        avg = jnp.mean(xc, axis=0, keepdims=True)                 # (1, HW)
        mx = jnp.max(xc, axis=0, keepdims=True)                   # (1, HW)
        am_rows.append(jnp.concatenate([avg, mx], axis=1))        # (1, 2*HW)

    # Batched 7x7 conv for the whole block as ONE MXU matmul:
    #   conv[b, :] = [avg_b ; max_b] @ [A_avg ; A_max]   (M=Bb, K=2*HW, N=HW)
    am = jnp.concatenate(am_rows, axis=0)                         # (Bb, 2*HW)
    conv = jnp.dot(am, a_cat_ref[...], preferred_element_type=jnp.float32)
    sa = _sigmoid(conv + cb_ref[0])                               # (Bb, HW)

    for b in range(bb):
        o_ref[b] = (o_ref[b] * sa[b:b + 1, :]).astype(o_ref.dtype)


def _build_conv_matrix(conv_w, H, W):
    """Fused Toeplitz matrix A_cat = [A_avg ; A_max], shape (2*HW, HW).

    A_c[q, p] = conv_w[0, c, qi-pi+P, qj-pj+P] (0 outside the KxK window), so
    (flat_map_row @ A_c)[p] == Conv2d(padding=P) applied to map channel c.
    """
    K = conv_w.shape[-1]
    P = K // 2
    HW = H * W
    pos = jnp.arange(HW, dtype=jnp.int32)
    pi, pj = pos // W, pos % W
    di = pi[:, None] - pi[None, :] + P
    dj = pj[:, None] - pj[None, :] + P
    valid = (di >= 0) & (di < K) & (dj >= 0) & (dj < K)
    dic = jnp.clip(di, 0, K - 1)
    djc = jnp.clip(dj, 0, K - 1)
    a_avg = jnp.where(valid, conv_w[0, 0][dic, djc], 0.0).astype(jnp.float32)
    a_max = jnp.where(valid, conv_w[0, 1][dic, djc], 0.0).astype(jnp.float32)
    return jnp.concatenate([a_avg, a_max], axis=0)                # (2*HW, HW)


def prepare_ham_params(params, H, W):
    """One-time parameter preprocessing (hoisted out of the per-call path)."""
    w1, w2, conv_w, conv_b = params
    w1t = jnp.asarray(w1, jnp.float32).T                          # (C, Cr)
    w2f = jnp.asarray(w2, jnp.float32)                            # (C, Cr)
    a_cat = _build_conv_matrix(jnp.asarray(conv_w, jnp.float32), H, W)
    cb = jnp.asarray(conv_b, jnp.float32).reshape(1)              # (1,) scalar
    return w1t, w2f, a_cat, cb


def _pick_batch_block(B, C, HW, *, max_block_bytes=2 << 20, max_images=32):
    """Images per grid step: big enough to amortize per-step overhead and fill
    the MXU M dim, small enough for VMEM, and >= 2 grid steps so both v7x
    TensorCores get work along the "parallel" batch axis."""
    if B <= 1:
        return 1
    per_image = C * HW * 4
    blk = max(1, min(max_images, max_block_bytes // max(per_image, 1)))
    blk = max(1, min(blk, pl.cdiv(B, 2)))
    return int(blk)


def ham_forward(x, prepared_params, *, batch_block=None):
    """x: (B, C, H, W) float32 -> (B, C, H, W) float32."""
    w1t, w2, a_cat, cb = prepared_params
    B, C, H, W = x.shape
    HW = H * W
    Cr = w1t.shape[1]
    assert a_cat.shape == (2 * HW, HW)

    if batch_block is None:
        batch_block = _pick_batch_block(B, C, HW)
    b_blk = int(batch_block)
    grid = (pl.cdiv(B, b_blk),)

    x2 = x.reshape(B, C, HW)                      # lane-dense layout (free reshape)

    blk_bytes = b_blk * C * HW * 4
    weight_bytes = (2 * HW * HW + 2 * C * Cr) * 4
    vmem_limit = int(min(max(6 * blk_bytes + 2 * weight_bytes + (4 << 20),
                             16 << 20), 48 << 20))

    out = pl.pallas_call(
        _ham_kernel,
        out_shape=jax.ShapeDtypeStruct((B, C, HW), jnp.float32),
        grid_spec=pltpu.PrefetchScalarGridSpec(
            num_scalar_prefetch=0,
            grid=grid,
            in_specs=[
                pl.BlockSpec((b_blk, C, HW), lambda i: (i, 0, 0)),      # x block
                pl.BlockSpec((C, Cr), lambda i: (0, 0),                 # W1^T
                             pipeline_mode=pl.Buffered(1)),
                pl.BlockSpec((C, Cr), lambda i: (0, 0),                 # W2
                             pipeline_mode=pl.Buffered(1)),
                pl.BlockSpec((2 * HW, HW), lambda i: (0, 0),            # A_cat
                             pipeline_mode=pl.Buffered(1)),
                pl.BlockSpec(memory_space=pltpu.MemorySpace.SMEM),      # conv bias
            ],
            out_specs=pl.BlockSpec((b_blk, C, HW), lambda i: (i, 0, 0)),
        ),
        compiler_params=pltpu.CompilerParams(
            dimension_semantics=("parallel",),
            vmem_limit_bytes=vmem_limit),
    )(x2, w1t, w2, a_cat, cb)

    return out.reshape(B, C, H, W)


def init_params(key, num_channels, reduction_ratio=16, kernel_size=7):
    """Shapes match the PyTorch HAM module (deterministic init)."""
    c = num_channels
    cr = max(c // reduction_ratio, 1)
    k1, k2, k3, k4 = jax.random.split(key, 4)

    b1 = 1.0 / math.sqrt(c)
    w1 = jax.random.uniform(k1, (cr, c), jnp.float32, -b1, b1)    # Linear(C, C//r, bias=False)
    b2 = 1.0 / math.sqrt(cr)
    w2 = jax.random.uniform(k2, (c, cr), jnp.float32, -b2, b2)    # Linear(C//r, C, bias=False)
    bc = 1.0 / math.sqrt(2 * kernel_size * kernel_size)
    conv_w = jax.random.uniform(k3, (1, 2, kernel_size, kernel_size),
                                jnp.float32, -bc, bc)             # Conv2d(2, 1, 7, padding=3)
    conv_b = jax.random.uniform(k4, (1,), jnp.float32, -bc, bc)
    return w1, w2, conv_w, conv_b


def _reference(x, params):
    """Pure-JAX reference for the HAM forward pass."""
    w1, w2, conv_w, conv_b = params
    hi = jax.lax.Precision.HIGHEST
    m = jnp.mean(x, axis=(2, 3))                                      # (B, C)
    h = jnp.maximum(jnp.dot(m, w1.T, precision=hi), 0.0)              # (B, Cr)
    ca = jax.nn.sigmoid(jnp.dot(h, w2.T, precision=hi))               # (B, C)
    xc = x * ca[:, :, None, None]
    avg = jnp.mean(xc, axis=1, keepdims=True)
    mx = jnp.max(xc, axis=1, keepdims=True)
    s = jnp.concatenate([avg, mx], axis=1)                            # (B, 2, H, W)
    p = conv_w.shape[-1] // 2
    conv = jax.lax.conv_general_dilated(
        s, conv_w, window_strides=(1, 1), padding=((p, p), (p, p)),
        dimension_numbers=("NCHW", "OIHW", "NCHW"), precision=hi)
    sa = jax.nn.sigmoid(conv + conv_b[0])
    return xc * sa


if __name__ == "__main__":
    key = jax.random.PRNGKey(0)
    kp, kx = jax.random.split(key)

    # Small HAM block: 64 channels (hidden = 64 // 16 = 4), 16x16 feature map.
    B, C, H, W = 2, 64, 16, 16
    params = init_params(kp, C)
    x = jax.random.normal(kx, (B, C, H, W), jnp.float32)

    prepared = prepare_ham_params(params, H, W)   # one-time weight preprocessing

    fwd = jax.jit(ham_forward)
    out = jax.block_until_ready(fwd(x, prepared))

    ref = _reference(x, params)
    assert out.shape == (B, C, H, W), out.shape
    max_err = float(jnp.max(jnp.abs(out - ref)))
    assert jnp.allclose(out, ref, atol=2e-3, rtol=2e-3), max_err

    print("KERNEL_OK")
</pallas_src>

<mosaic_0001>
module attributes {stable_mosaic.version = 11 : i64} {
  func.func @_ham_kernel(%arg0: i32, %arg1: memref<1x64x256xf32, #tpu.memory_space<vmem>>, %arg2: memref<64x4xf32, #tpu.memory_space<vmem>>, %arg3: memref<64x4xf32, #tpu.memory_space<vmem>>, %arg4: memref<512x256xf32, #tpu.memory_space<vmem>>, %arg5: memref<1xf32, #tpu.memory_space<smem>>, %arg6: memref<1x64x256xf32, #tpu.memory_space<vmem>>) attributes {dimension_semantics = [#tpu.dimension_semantics<parallel>], iteration_bounds = array<i64: 2>, scalar_prefetch = 0 : i64, scratch_operands = 0 : i64, tpu.core_type = #tpu.core_type<tc>, window_params = [{transform_indices = @transform_0, window_bounds = array<i64: 1, 64, 256>}, {pipeline_mode = #tpu.pipeline_mode<synchronous>, transform_indices = @transform_1, window_bounds = array<i64: 64, 4>}, {pipeline_mode = #tpu.pipeline_mode<synchronous>, transform_indices = @transform_2, window_bounds = array<i64: 64, 4>}, {pipeline_mode = #tpu.pipeline_mode<synchronous>, transform_indices = @transform_3, window_bounds = array<i64: 512, 256>}, {transform_indices = @transform_4, window_bounds = array<i64: 1>}, {transform_indices = @transform_5, window_bounds = array<i64: 1, 64, 256>}]} {
    %c0 = arith.constant 0 : index
    %c0_0 = arith.constant 0 : index
    %0 = vector.load %arg2[%c0, %c0_0] : memref<64x4xf32, #tpu.memory_space<vmem>>, vector<64x4xf32>
    %c0_1 = arith.constant 0 : index
    %c0_2 = arith.constant 0 : index
    %1 = vector.load %arg3[%c0_1, %c0_2] : memref<64x4xf32, #tpu.memory_space<vmem>>, vector<64x4xf32>
    %c0_3 = arith.constant 0 : index
    %c0_4 = arith.constant 0 : index
    %c0_5 = arith.constant 0 : index
    %2 = vector.load %arg1[%c0_3, %c0_4, %c0_5] : memref<1x64x256xf32, #tpu.memory_space<vmem>>, vector<1x64x256xf32>
    %3 = vector.shape_cast %2 : vector<1x64x256xf32> to vector<64x256xf32>
    %cst = arith.constant dense<0.000000e+00> : vector<64xf32>
    %4 = vector.multi_reduction <add>, %3, %cst [1] : vector<64x256xf32> to vector<64xf32>
    %5 = vector.shape_cast %4 : vector<64xf32> to vector<64x1xf32>
    %cst_6 = arith.constant 2.560000e+02 : f32
    %6 = vector.broadcast %cst_6 : f32 to vector<64x1xf32>
    %7 = arith.divf %5, %6 : vector<64x1xf32>
    %8 = vector.broadcast %7 : vector<64x1xf32> to vector<64x4xf32>
    %9 = arith.mulf %0, %8 : vector<64x4xf32>
    %cst_7 = arith.constant dense<0.000000e+00> : vector<4xf32>
    %10 = vector.multi_reduction <add>, %9, %cst_7 [0] : vector<64x4xf32> to vector<4xf32>
    %11 = vector.shape_cast %10 : vector<4xf32> to vector<1x4xf32>
    %cst_8 = arith.constant 0.000000e+00 : f32
    %12 = vector.broadcast %cst_8 : f32 to vector<1x4xf32>
    %13 = arith.maximumf %11, %12 : vector<1x4xf32>
    %14 = vector.broadcast %13 : vector<1x4xf32> to vector<64x4xf32>
    %15 = arith.mulf %1, %14 : vector<64x4xf32>
    %cst_9 = arith.constant dense<0.000000e+00> : vector<64xf32>
    %16 = vector.multi_reduction <add>, %15, %cst_9 [1] : vector<64x4xf32> to vector<64xf32>
    %17 = vector.shape_cast %16 : vector<64xf32> to vector<64x1xf32>
    %cst_10 = arith.constant 5.000000e-01 : f32
    %18 = vector.broadcast %cst_10 : f32 to vector<64x1xf32>
    %19 = arith.mulf %18, %17 : vector<64x1xf32>
    %20 = math.tanh %19 : vector<64x1xf32>
    %cst_11 = arith.constant 1.000000e+00 : f32
    %21 = vector.broadcast %cst_11 : f32 to vector<64x1xf32>
    %22 = arith.addf %20, %21 : vector<64x1xf32>
    %cst_12 = arith.constant 5.000000e-01 : f32
    %23 = vector.broadcast %cst_12 : f32 to vector<64x1xf32>
    %24 = arith.mulf %23, %22 : vector<64x1xf32>
    %25 = vector.broadcast %24 : vector<64x1xf32> to vector<64x256xf32>
    %26 = arith.mulf %3, %25 : vector<64x256xf32>
    %c0_13 = arith.constant 0 : index
    %c0_14 = arith.constant 0 : index
    %c0_15 = arith.constant 0 : index
    %27 = vector.load %arg6[%c0_13, %c0_14, %c0_15] : memref<1x64x256xf32, #tpu.memory_space<vmem>>, vector<1x64x256xf32>
    %28 = vector.shape_cast %27 : vector<1x64x256xf32> to vector<64x256xf32>
    %29 = vector.shape_cast %26 : vector<64x256xf32> to vector<1x64x256xf32>
    tpu.vector_store %arg6[%c0_13, %c0_14, %c0_15], %29 {strides = array<i32>} : memref<1x64x256xf32, #tpu.memory_space<vmem>>, vector<1x64x256xf32>,
    %cst_16 = arith.constant dense<0.000000e+00> : vector<256xf32>
    %30 = vector.multi_reduction <add>, %26, %cst_16 [0] : vector<64x256xf32> to vector<256xf32>
    %31 = vector.shape_cast %30 : vector<256xf32> to vector<1x256xf32>
    %cst_17 = arith.constant 6.400000e+01 : f32
    %32 = vector.broadcast %cst_17 : f32 to vector<1x256xf32>
    %33 = arith.divf %31, %32 : vector<1x256xf32>
    %cst_18 = arith.constant dense<0xFF800000> : vector<256xf32>
    %34 = vector.multi_reduction <maximumf>, %26, %cst_18 [0] : vector<64x256xf32> to vector<256xf32>
    %35 = vector.shape_cast %34 : vector<256xf32> to vector<1x256xf32>
    %36 = tpu.concatenate %33, %35 in 1 : vector<1x256xf32>, vector<1x256xf32> -> vector<1x512xf32>
    %c0_19 = arith.constant 0 : index
    %c0_20 = arith.constant 0 : index
    %37 = vector.load %arg4[%c0_19, %c0_20] : memref<512x256xf32, #tpu.memory_space<vmem>>, vector<512x256xf32>
    %cst_21 = arith.constant dense<0.000000e+00> : vector<1x256xf32>
    %38 = tpu.matmul %36, %37, %cst_21 {dimension_numbers = #tpu.dot_dimension_numbers<[1], [0], [0], [1], [0, 0, 1, 1], [], []>} : vector<1x512xf32>, vector<512x256xf32>, vector<1x256xf32> -> vector<1x256xf32>
    %c0_22 = arith.constant 0 : index
    %39 = memref.load %arg5[%c0_22] : memref<1xf32, #tpu.memory_space<smem>>
    %40 = vector.broadcast %39 : f32 to vector<1x256xf32>
    %41 = arith.addf %38, %40 : vector<1x256xf32>
    %cst_23 = arith.constant 5.000000e-01 : f32
    %42 = vector.broadcast %cst_23 : f32 to vector<1x256xf32>
    %43 = arith.mulf %42, %41 : vector<1x256xf32>
    %44 = math.tanh %43 : vector<1x256xf32>
    %cst_24 = arith.constant 1.000000e+00 : f32
    %45 = vector.broadcast %cst_24 : f32 to vector<1x256xf32>
    %46 = arith.addf %44, %45 : vector<1x256xf32>
    %cst_25 = arith.constant 5.000000e-01 : f32
    %47 = vector.broadcast %cst_25 : f32 to vector<1x256xf32>
    %48 = arith.mulf %47, %46 : vector<1x256xf32>
    %c0_26 = arith.constant 0 : index
    %c0_27 = arith.constant 0 : index
    %c0_28 = arith.constant 0 : index
    %49 = vector.load %arg6[%c0_26, %c0_27, %c0_28] : memref<1x64x256xf32, #tpu.memory_space<vmem>>, vector<1x64x256xf32>
    %50 = vector.shape_cast %49 : vector<1x64x256xf32> to vector<64x256xf32>
    %51 = vector.broadcast %48 : vector<1x256xf32> to vector<64x256xf32>
    %52 = arith.mulf %50, %51 : vector<64x256xf32>
    %c0_29 = arith.constant 0 : index
    %c0_30 = arith.constant 0 : index
    %c0_31 = arith.constant 0 : index
    %53 = vector.load %arg6[%c0_29, %c0_30, %c0_31] : memref<1x64x256xf32, #tpu.memory_space<vmem>>, vector<1x64x256xf32>
    %54 = vector.shape_cast %53 : vector<1x64x256xf32> to vector<64x256xf32>
    %55 = vector.shape_cast %52 : vector<64x256xf32> to vector<1x64x256xf32>
    tpu.vector_store %arg6[%c0_29, %c0_30, %c0_31], %55 {strides = array<i32>} : memref<1x64x256xf32, #tpu.memory_space<vmem>>, vector<1x64x256xf32>,
    return
  }
  func.func @transform_0(%arg0: i32) -> (i32, i32, i32) {
    %c0_i32 = arith.constant 0 : i32
    %c0_i32_0 = arith.constant 0 : i32
    %c0_i32_1 = arith.constant 0 : i32
    return %arg0, %c0_i32, %c0_i32_0 : i32, i32, i32
  }
  func.func @transform_1(%arg0: i32) -> (i32, i32) {
    %c0_i32 = arith.constant 0 : i32
    %c0_i32_0 = arith.constant 0 : i32
    %c0_i32_1 = arith.constant 0 : i32
    return %c0_i32, %c0_i32_0 : i32, i32
  }
  func.func @transform_2(%arg0: i32) -> (i32, i32) {
    %c0_i32 = arith.constant 0 : i32
    %c0_i32_0 = arith.constant 0 : i32
    %c0_i32_1 = arith.constant 0 : i32
    return %c0_i32, %c0_i32_0 : i32, i32
  }
  func.func @transform_3(%arg0: i32) -> (i32, i32) {
    %c0_i32 = arith.constant 0 : i32
    %c0_i32_0 = arith.constant 0 : i32
    %c0_i32_1 = arith.constant 0 : i32
    return %c0_i32, %c0_i32_0 : i32, i32
  }
  func.func @transform_4(%arg0: i32) -> i32 {
    %c0_i32 = arith.constant 0 : i32
    %c0_i32_0 = arith.constant 0 : i32
    return %c0_i32 : i32
  }
  func.func @transform_5(%arg0: i32) -> (i32, i32, i32) {
    %c0_i32 = arith.constant 0 : i32
    %c0_i32_0 = arith.constant 0 : i32
    %c0_i32_1 = arith.constant 0 : i32
    return %arg0, %c0_i32, %c0_i32_0 : i32, i32, i32
  }
}

</mosaic_0001>

<bundles_post_ra>
// kernel: ham_forward.1
= control target key start
LH: loop header
LB: loop body
LE: loop exit
PB: predicated region body
PF: predicated region fallthrough
CT: control target
= control target key end

     0   :  { %s1285_s0 = inlined_call_operand.vmem [shape: f32[2,64,256], index: 0, kind: input, shape index: {}]   ;;  %s1286_s1 = inlined_call_operand.vmem [shape: f32[64,4], index: 1, kind: input, shape index: {}]   ;;  %s1287_s2 = inlined_call_operand.vmem [shape: f32[64,4], index: 2, kind: input, shape index: {}]   ;;  %s1288_s3 = inlined_call_operand.hbm [shape: f32[512,256], index: 3, kind: input, shape index: {}]   ;;  %s1289_s4 = inlined_call_operand.<no memory space> [shape: f32[1], index: 4, kind: input, shape index: {}]   ;;  %s1290_s5 = inlined_call_operand.vmem [shape: f32[2,64,256], index: 5, kind: output, shape index: {}]  }
   0x1   :  { %10 = sst [smem:[#allocation2]] %s1289_s4 }
   0x2   :  { %11 = vsyncpa [#allocation4], 0  ;;  %s1021_s20 = smov 0  }
   0x3 LB: > { %s891_s21 = sadd.s32 4294967295, %s983_s20   ;;  %p893_p0 = scmp.ge.s32.totalorder %s983_s20, 1  ;;  %s983_s20 = sphi %s1021_s20, %s17_s20  }
   0x4   : > { %p158_p1 = scmp.lt.s32.totalorder %s983_s20, 3  ;;  %s985_s22 = smov [#allocation3]  }
   0x5   : > { %s176_s23 = sshll.u32 %s985_s22, 4  ;;  %p914_p3 = scmp.eq.s32.totalorder %s891_s21, 0  ;;  %s177_s23 = int_to_ptr.vmem [resolvable:$true] %s176_s23 }
   0x6   : > { %p1029_p2 = pnand %p893_p0, %p158_p1  ;;  %s958_s4 = scalar_lea.vmem %s177_s23, 16384 }
   0x7   : > { %p959_p7 = scmp.ne.s32.totalorder %s177_s23, %s958_s4  ;;  %p966_p10 = scmp.lt.s32.totalorder %s177_s23, %s177_s23 }
   0x8   : > { %p910_p4 = pneg %p1029_p2  ;;  %p967_p11 = scmp.lt.s32.totalorder %s958_s4, %s958_s4 }
   0xa   : > { %p911_p5 = pnand %p914_p3, %p910_p4  ;;  %p968_p12 = por %p967_p11, %p966_p10 }
   0xc   : > { %p949_p6 = pneg %p911_p5 }
   0xe   : > { %p961_p8 = pnand %p959_p7, %p949_p6 }
  0x10   : > { %p962_p9 = pneg %p961_p8 }
  0x12   : > { %p969_p13 = pnand %p968_p12, %p962_p9 }
  0x14   : > { %972 = shalt.err (!%p969_p13)
}
  0x15   : > { %s986_s25 = smov 256   ;;  %s987_s26 = smov 16  }
  0x16   : > { %913 = dma.hbm_to_vmem [thread:$0]  (!%p911_p5), %s1288_s3, 16384, %s177_s23, [#allocation4], %s986_s25, %s986_s25, %s987_s26  }
  0x17   : > { %203 = sbr.rel (%p1029_p2) target bundleno = 637 (0x27d), region = 40 }
  0x1c   : > { %978 = dma.done.wait (%p914_p3), [#allocation4], 16384  }
  0x1d   : > { %980 = vsyncadd (%p914_p3), [#allocation4], 4294950912  ;;  %p231_p0 = scmp.lt.s32.totalorder %s891_s21, 1  ;;  %v583_v24 = vld [vmem:[#allocation3 + $0x2f8] sm:$0xff]  ;;  %v582_v25 = vld [vmem:[#allocation3 + $0x2f0] sm:$0xff]  ;;  %vm314_vm0 = vcmask 31744  }
  0x1e   : > { %v519_v26 = vld [vmem:[#allocation3 + $0xf8] sm:$0xff]  ;;  %689 = vmatprep.subr.mxu1 %v583_v24  ;;  %v581_v27 = vld [vmem:[#allocation3 + $0x2e8] sm:$0xff]  ;;  %v518_v28 = vld [vmem:[#allocation3 + $0xf0] sm:$0xff]  ;;  %s616_s17 = sld [smem:[#allocation2]] }
  0x1f   : > { %s1293_s21 = smov (!%p231_p0, %s891_s21), 1  ;;  %618 = vmatprep.subr.mxu0 %v519_v26  ;;  %v580_v29 = vld [vmem:[#allocation3 + $0x2e0] sm:$0xff]  ;;  %690 = vmatpush1.msra.mxu1 %v582_v25  ;;  %v517_v30 = vld [vmem:[#allocation3 + $0xe8] sm:$0xff]  ;;  %v579_v31 = vld [vmem:[#allocation3 + $0x2d8] sm:$0xff] }
  0x20   : > { %s904_s29 = sshll.u32 %s1293_s21, 7  ;;  %619 = vmatpush1.msra.mxu0 %v518_v28  ;;  %v516_v32 = vld [vmem:[#allocation3 + $0xe0] sm:$0xff]  ;;  %691 = vmatprep.subr.mxu1 %v581_v27  ;;  %v578_v33 = vld [vmem:[#allocation3 + $0x2d0] sm:$0xff]  ;;  %v515_v34 = vld [vmem:[#allocation3 + $0xd8] sm:$0xff] }
  0x21   : > { %s235_s7 = scalar_lea.vmem %s1285_s0, %s904_s29  ;;  %620 = vmatprep.subr.mxu0 %v517_v30  ;;  %692 = vmatpush1.msra.mxu1 %v580_v29  ;;  %v577_v35 = vld [vmem:[#allocation3 + $0x2c8] sm:$0xff]  ;;  %v514_v36 = vld [vmem:[#allocation3 + $0xd0] sm:$0xff]  ;;  %v576_v38 = vld [vmem:[#allocation3 + $0x2c0] sm:$0xff]  ;;  %s1248_s22 = scalar_lea.vmem %s1290_s5, %s904_s29 }
  0x22   : > { %v1051_v0 = vld [vmem:[%s235_s7] sm:$0xff]  ;;  %v1053_v1 = vld [vmem:[%s235_s7 + $0x8] sm:$0xff]  ;;  %v1061_v5 = vld [vmem:[%s235_s7 + $0x10] sm:$0xff]  ;;  %621 = vmatpush1.msra.mxu0 %v516_v32  ;;  %693 = vmatprep.subr.mxu1 %v579_v31 }
  0x23   : > { %v1055_v2 = vld [vmem:[%s235_s7 + $0x20] sm:$0xff]  ;;  %v273_v3 = vadd.f32 %v1053_v1, %v1051_v0  ;;  %v1059_v4 = vld [vmem:[%s235_s7 + $0x28] sm:$0xff]  ;;  %v1063_v6 = vld [vmem:[%s235_s7 + $0x18] sm:$0xff]  ;;  %622 = vmatprep.subr.mxu0 %v515_v34  ;;  %694 = vmatpush1.msra.mxu1 %v578_v33 }
  0x24   : > { %v279_v7 = vadd.f32 %v1059_v4, %v1055_v2  ;;  %v1067_v8 = vld [vmem:[%s235_s7 + $0x30] sm:$0xff]  ;;  %v1069_v9 = vld [vmem:[%s235_s7 + $0x38] sm:$0xff]  ;;  %v276_v10 = vadd.f32 %v1063_v6, %v1061_v5  ;;  %v1075_v12 = vld [vmem:[%s235_s7 + $0x40] sm:$0xff]  ;;  %623 = vmatpush1.msra.mxu0 %v514_v36  ;;  %695 = vmatprep.subr.mxu1 %v577_v35 }
  0x25   : > { %274 = vadd.xlane.f32.xlu0 %v273_v3  ;;  %v282_v11 = vadd.f32 %v1069_v9, %v1067_v8  ;;  %v1077_v13 = vld [vmem:[%s235_s7 + $0x48] sm:$0xff]  ;;  %v1079_v14 = vld [vmem:[%s235_s7 + $0x50] sm:$0xff]  ;;  %v1081_v15 = vld [vmem:[%s235_s7 + $0x58] sm:$0xff]  ;;  %696 = vmatpush1.msra.mxu1 %v576_v38 }
  0x26   : > { %280 = vadd.xlane.f32.xlu1 %v279_v7  ;;  %v285_v16 = vadd.f32 %v1077_v13, %v1075_v12  ;;  %v288_v17 = vadd.f32 %v1081_v15, %v1079_v14  ;;  %v1087_v18 = vld [vmem:[%s235_s7 + $0x60] sm:$0xff]  ;;  %v1089_v19 = vld [vmem:[%s235_s7 + $0x68] sm:$0xff]  ;;  %v1091_v20 = vld [vmem:[%s235_s7 + $0x70] sm:$0xff] }
  0x27   : > { %v1093_v21 = vld [vmem:[%s235_s7 + $0x78] sm:$0xff]  ;;  %v291_v22 = vadd.f32 %v1089_v19, %v1087_v18  ;;  %v513_v37 = vld [vmem:[#allocation3 + $0xc8] sm:$0xff]  ;;  %v512_v39 = vld [vmem:[#allocation3 + $0xc0] sm:$0xff] }
  0x28   : > { %v294_v23 = vadd.f32 %v1093_v21, %v1091_v20  ;;  %v575_v40 = vld [vmem:[#allocation3 + $0x2b8] sm:$0xff]  ;;  %624 = vmatprep.subr.mxu0 %v513_v37  ;;  %v574_v42 = vld [vmem:[#allocation3 + $0x2b0] sm:$0xff]  ;;  %v573_v44 = vld [vmem:[#allocation3 + $0x2a8] sm:$0xff] }
  0x29   : > { %277 = vadd.xlane.f32.xlu0 %v276_v10  ;;  %v511_v41 = vld [vmem:[#allocation3 + $0xb8] sm:$0xff]  ;;  %v510_v43 = vld [vmem:[#allocation3 + $0xb0] sm:$0xff]  ;;  %625 = vmatpush1.msra.mxu0 %v512_v39  ;;  %v509_v45 = vld [vmem:[#allocation3 + $0xa8] sm:$0xff] }
  0x2a   : > { %283 = vadd.xlane.f32.xlu1 %v282_v11  ;;  %697 = vmatprep.subr.mxu1 %v575_v40  ;;  %v572_v46 = vld [vmem:[#allocation3 + $0x2a0] sm:$0xff]  ;;  %v571_v47 = vld [vmem:[#allocation3 + $0x298] sm:$0xff]  ;;  %v243_v53 = vld [vmem:[%s1286_s1 + $0x10] sm:$0xff] }
  0x2b   : > { %626 = vmatprep.subr.mxu0 %v511_v41  ;;  %698 = vmatpush1.msra.mxu1 %v574_v42  ;;  %v241_v51 = vld [vmem:[%s1286_s1] sm:$0xff]  ;;  %v242_v55 = vld [vmem:[%s1286_s1 + $0x8] sm:$0xff]  ;;  %v244_v59 = vld [vmem:[%s1286_s1 + $0x18] sm:$0xff] }
  0x2c   : > { %627 = vmatpush1.msra.mxu0 %v510_v43  ;;  %699 = vmatprep.subr.mxu1 %v573_v44  ;;  %v245_v7 = vld [vmem:[%s1286_s1 + $0x20] sm:$0xff]  ;;  %v247_v31 = vld [vmem:[%s1286_s1 + $0x30] sm:$0xff]  ;;  %v248_v35 = vld [vmem:[%s1286_s1 + $0x38] sm:$0xff] }
  0x2d   : > { %286 = vadd.xlane.f32.xlu0 %v285_v16  ;;  %628 = vmatprep.subr.mxu0 %v509_v45 }
  0x2e   : > { %289 = vadd.xlane.f32.xlu1 %v288_v17  ;;  %700 = vmatpush1.msra.mxu1 %v572_v46 }
  0x2f   : > { %701 = vmatprep.subr.mxu1 %v571_v47 }
  0x31   : > { %292 = vadd.xlane.f32.xlu0 %v291_v22  ;;  %v246_v22 = vld [vmem:[%s1286_s1 + $0x28] sm:$0xff] }
  0x32   : > { %295 = vadd.xlane.f32.xlu1 %v294_v23 }
  0xae   : > { %v275_v48 = vpop.xlane.xlu0 %274 }
  0xaf   : > { %v298_v49 = vmul.f32 0.00390625, %v275_v48  ;;  %v281_v50 = vpop.xlane.xlu1 %280 }
  0xb0   : > { %v300_v52 = vmul.f32 0.00390625, %v281_v50 }
  0xb1   : > { %v306_v56 = vmul.f32 %v298_v49, %v241_v51 }
  0xb2   : > { %v278_v54 = vpop.xlane.xlu0 %277  ;;  %v308_v61 = vmul.f32 %v300_v52, %v243_v53  ;;  %v250_v53 = vld [vmem:[%s1287_s2 + $0x8] sm:$0xff] }
  0xb3   : > { %v299_v57 = vmul.f32 0.00390625, %v278_v54  ;;  %v284_v58 = vpop.xlane.xlu1 %283  ;;  %v315_v10 = vsel %vm314_vm0, %v306_v56, 0.0  ;;  %v249_v54 = vld [vmem:[%s1287_s2] sm:$0xff]  ;;  %v252_v56 = vld [vmem:[%s1287_s2 + $0x18] sm:$0xff] }
  0xb4   : > { %v301_v60 = vmul.f32 0.00390625, %v284_v58  ;;  %v318_v25 = vsel %vm314_vm0, %v308_v61, 0.0 }
  0xb5   : > { %v307_v62 = vmul.f32 %v299_v57, %v242_v55  ;;  %v251_v57 = vld [vmem:[%s1287_s2 + $0x10] sm:$0xff] }
  0xb6   : > { %v309_v63 = vmul.f32 %v301_v60, %v244_v59  ;;  %v287_v3 = vpop.xlane.xlu0 %286 }
  0xb7   : > { %v316_v11 = vsel %vm314_vm0, %v307_v62, 0.0  ;;  %v302_v16 = vmul.f32 0.00390625, %v287_v3  ;;  %v290_v17 = vpop.xlane.xlu1 %289  ;;  %v254_v3 = vld [vmem:[%s1287_s2 + $0x28] sm:$0xff] }
  0xb8   : > { %v317_v23 = vadd.f32 %v316_v11, %v315_v10  ;;  %v303_v24 = vmul.f32 0.00390625, %v290_v17  ;;  %v320_v26 = vsel %vm314_vm0, %v309_v63, 0.0 }
  0xb9   : > { %v310_v27 = vmul.f32 %v302_v16, %v245_v7  ;;  %v253_v7 = vld [vmem:[%s1287_s2 + $0x20] sm:$0xff] }
  0xba   : > { %v319_v28 = vadd.f32 %v318_v25, %v317_v23  ;;  %v311_v29 = vmul.f32 %v303_v24, %v246_v22  ;;  %v293_v30 = vpop.xlane.xlu0 %292  ;;  %v256_v22 = vld [vmem:[%s1287_s2 + $0x38] sm:$0xff]  ;;  %v255_v23 = vld [vmem:[%s1287_s2 + $0x30] sm:$0xff] }
  0xbb   : > { %v322_v32 = vsel %vm314_vm0, %v310_v27, 0.0  ;;  %v304_v33 = vmul.f32 0.00390625, %v293_v30  ;;  %v296_v34 = vpop.xlane.xlu1 %295 }
  0xbc   : > { %v321_v36 = vadd.f32 %v320_v26, %v319_v28  ;;  %v305_v37 = vmul.f32 0.00390625, %v296_v34  ;;  %v324_v38 = vsel %vm314_vm0, %v311_v29, 0.0  ;;  %v508_v28 = vld [vmem:[#allocation3 + $0xa0] sm:$0xff]  ;;  %v570_v29 = vld [vmem:[#allocation3 + $0x290] sm:$0xff] }
  0xbd   : > { %v312_v39 = vmul.f32 %v304_v33, %v247_v31  ;;  %629 = vmatpush1.msra.mxu0 %v508_v28  ;;  %702 = vmatpush1.msra.mxu1 %v570_v29  ;;  %v569_v33 = vld [vmem:[#allocation3 + $0x288] sm:$0xff]  ;;  %v506_v34 = vld [vmem:[#allocation3 + $0x90] sm:$0xff]  ;;  %v611_v29 = vld [vmem:[#allocation3 + $0x3d8] sm:$0xff] }
  0xbe   : > { %v323_v40 = vadd.f32 %v322_v32, %v321_v36  ;;  %v313_v41 = vmul.f32 %v305_v37, %v248_v35  ;;  %v507_v32 = vld [vmem:[#allocation3 + $0x98] sm:$0xff]  ;;  %v568_v35 = vld [vmem:[#allocation3 + $0x280] sm:$0xff]  ;;  %703 = vmatprep.subr.mxu1 %v569_v33  ;;  %v505_v36 = vld [vmem:[#allocation3 + $0x88] sm:$0xff] }
  0xbf   : > { %v326_v42 = vsel %vm314_vm0, %v312_v39, 0.0  ;;  %630 = vmatprep.subr.mxu0 %v507_v32  ;;  %v567_v37 = vld [vmem:[#allocation3 + $0x278] sm:$0xff]  ;;  %704 = vmatpush1.msra.mxu1 %v568_v35  ;;  %v566_v39 = vld [vmem:[#allocation3 + $0x270] sm:$0xff]  ;;  %v549_v28 = vld [vmem:[#allocation3 + $0x1e8] sm:$0xff] }
  0xc0   : > { %v325_v43 = vadd.f32 %v324_v38, %v323_v40  ;;  %v328_v44 = vsel %vm314_vm0, %v313_v41, 0.0  ;;  %631 = vmatpush1.msra.mxu0 %v506_v34  ;;  %v504_v38 = vld [vmem:[#allocation3 + $0x80] sm:$0xff]  ;;  %705 = vmatprep.subr.mxu1 %v567_v37  ;;  %v503_v40 = vld [vmem:[#allocation3 + $0x78] sm:$0xff]  ;;  %v565_v41 = vld [vmem:[#allocation3 + $0x268] sm:$0xff] }
  0xc1   : > { %632 = vmatprep.subr.mxu0 %v505_v36  ;;  %706 = vmatpush1.msra.mxu1 %v566_v39  ;;  %v547_v32 = vld [vmem:[#allocation3 + $0x1d8] sm:$0xff]  ;;  %v609_v33 = vld [vmem:[#allocation3 + $0x3c8] sm:$0xff]  ;;  %v546_v34 = vld [vmem:[#allocation3 + $0x1d0] sm:$0xff] }
  0xc2   : > { %v327_v45 = vadd.f32 %v326_v42, %v325_v43  ;;  %633 = vmatpush1.msra.mxu0 %v504_v38  ;;  %v502_v42 = vld [vmem:[#allocation3 + $0x70] sm:$0xff]  ;;  %v564_v43 = vld [vmem:[#allocation3 + $0x260] sm:$0xff]  ;;  %707 = vmatprep.subr.mxu1 %v565_v41  ;;  %v545_v36 = vld [vmem:[#allocation3 + $0x1c8] sm:$0xff] }
  0xc3   : > { %634 = vmatprep.subr.mxu0 %v503_v40  ;;  %708 = vmatpush1.msra.mxu1 %v564_v43  ;;  %v608_v35 = vld [vmem:[#allocation3 + $0x3c0] sm:$0xff]  ;;  %v607_v37 = vld [vmem:[#allocation3 + $0x3b8] sm:$0xff]  ;;  %v606_v39 = vld [vmem:[#allocation3 + $0x3b0] sm:$0xff] }
  0xc4   : > { %v329_v46 = vadd.f32 %v328_v44, %v327_v45  ;;  %v501_v44 = vld [vmem:[#allocation3 + $0x68] sm:$0xff]  ;;  %v563_v45 = vld [vmem:[#allocation3 + $0x258] sm:$0xff]  ;;  %635 = vmatpush1.msra.mxu0 %v502_v42  ;;  %v544_v38 = vld [vmem:[#allocation3 + $0x1c0] sm:$0xff] }
  0xc5   : > { %636 = vmatprep.subr.mxu0 %v501_v44  ;;  %709 = vmatprep.subr.mxu1 %v563_v45  ;;  %v543_v40 = vld [vmem:[#allocation3 + $0x1b8] sm:$0xff]  ;;  %v605_v41 = vld [vmem:[#allocation3 + $0x3a8] sm:$0xff]  ;;  %v542_v42 = vld [vmem:[#allocation3 + $0x1b0] sm:$0xff] }
  0xc6   : > { %v330_v47 = vrot.slane %v329_v46, 4  ;;  %v604_v43 = vld [vmem:[#allocation3 + $0x3a0] sm:$0xff]  ;;  %v541_v44 = vld [vmem:[#allocation3 + $0x1a8] sm:$0xff]  ;;  %v603_v45 = vld [vmem:[#allocation3 + $0x398] sm:$0xff] }
  0xc8   : > { %v331_v48 = vadd.f32 %v330_v47, %v329_v46  ;;  %v500_v46 = vld [vmem:[#allocation3 + $0x60] sm:$0xff]  ;;  %v562_v47 = vld [vmem:[#allocation3 + $0x250] sm:$0xff] }
  0xc9   : > { %637 = vmatpush1.msra.mxu0 %v500_v46  ;;  %710 = vmatpush1.msra.mxu1 %v562_v47  ;;  %v540_v46 = vld [vmem:[#allocation3 + $0x1a0] sm:$0xff]  ;;  %v602_v47 = vld [vmem:[#allocation3 + $0x390] sm:$0xff] }
  0xca   : > { %v332_v49 = vrot.slane %v331_v48, 2 }
  0xcc   : > { %v333_v50 = vadd.f32 %v332_v49, %v331_v48  ;;  %v499_v48 = vld [vmem:[#allocation3 + $0x58] sm:$0xff]  ;;  %v561_v49 = vld [vmem:[#allocation3 + $0x248] sm:$0xff] }
  0xcd   : > { %638 = vmatprep.subr.mxu0 %v499_v48  ;;  %711 = vmatprep.subr.mxu1 %v561_v49  ;;  %v539_v48 = vld [vmem:[#allocation3 + $0x198] sm:$0xff]  ;;  %v601_v49 = vld [vmem:[#allocation3 + $0x388] sm:$0xff] }
  0xce   : > { %v334_v51 = vrot.slane %v333_v50, 1 }
  0xd0   : > { %v335_v52 = vadd.f32 %v334_v51, %v333_v50  ;;  %v498_v50 = vld [vmem:[#allocation3 + $0x50] sm:$0xff]  ;;  %v560_v51 = vld [vmem:[#allocation3 + $0x240] sm:$0xff] }
  0xd1   : > { %639 = vmatpush1.msra.mxu0 %v498_v50  ;;  %712 = vmatpush1.msra.mxu1 %v560_v51  ;;  %v538_v50 = vld [vmem:[#allocation3 + $0x190] sm:$0xff]  ;;  %v600_v51 = vld [vmem:[#allocation3 + $0x380] sm:$0xff] }
  0xd2   : > { %v336_v55 = vmax.f32 %v335_v52, 0.0  ;;  %v497_v52 = vld [vmem:[#allocation3 + $0x48] sm:$0xff] }
  0xd3   : > { %640 = vmatprep.subr.mxu0 %v497_v52  ;;  %v537_v52 = vld [vmem:[#allocation3 + $0x188] sm:$0xff] }
  0xd4   : > { %v338_v58 = vmul.f32 %v336_v55, %v250_v53  ;;  %v337_v59 = vmul.f32 %v336_v55, %v249_v54  ;;  %v340_v62 = vmul.f32 %v336_v55, %v252_v56  ;;  %v339_v63 = vmul.f32 %v336_v55, %v251_v57  ;;  %v559_v53 = vld [vmem:[#allocation3 + $0x238] sm:$0xff]  ;;  %v496_v54 = vld [vmem:[#allocation3 + $0x40] sm:$0xff]  ;;  %v557_v57 = vld [vmem:[#allocation3 + $0x228] sm:$0xff] }
  0xd5   : > { %v342_v16 = vmul.f32 %v336_v55, %v254_v3  ;;  %v341_v17 = vmul.f32 %v336_v55, %v253_v7  ;;  %v344_v26 = vmul.f32 %v336_v55, %v256_v22  ;;  %v343_v27 = vmul.f32 %v336_v55, %v255_v23  ;;  %713 = vmatprep.subr.mxu1 %v559_v53  ;;  %v558_v55 = vld [vmem:[#allocation3 + $0x230] sm:$0xff]  ;;  %v495_v56 = vld [vmem:[#allocation3 + $0x38] sm:$0xff]  ;;  %v553_v7 = vld [vmem:[#allocation3 + $0x208] sm:$0xff] }
  0xd6   : > { %v348_v60 = vsel %vm314_vm0, %v338_v58, 0.0  ;;  %v345_v61 = vsel %vm314_vm0, %v337_v59, 0.0  ;;  %v354_v10 = vsel %vm314_vm0, %v340_v62, 0.0  ;;  %v351_v11 = vsel %vm314_vm0, %v339_v63, 0.0  ;;  %641 = vmatpush1.msra.mxu0 %v496_v54  ;;  %714 = vmatpush1.msra.mxu1 %v558_v55  ;;  %v494_v58 = vld [vmem:[#allocation3 + $0x30] sm:$0xff]  ;;  %v556_v59 = vld [vmem:[#allocation3 + $0x220] sm:$0xff] }
  0xd7   : > { %349 = vadd.xlane.f32.xlu1 %v348_v60  ;;  %346 = vadd.xlane.f32.xlu0 %v345_v61  ;;  %v360_v24 = vsel %vm314_vm0, %v342_v16, 0.0  ;;  %v357_v25 = vsel %vm314_vm0, %v341_v17, 0.0  ;;  %v366_v30 = vsel %vm314_vm0, %v344_v26, 0.0  ;;  %v363_v31 = vsel %vm314_vm0, %v343_v27, 0.0  ;;  %v493_v60 = vld [vmem:[#allocation3 + $0x28] sm:$0xff]  ;;  %v555_v61 = vld [vmem:[#allocation3 + $0x218] sm:$0xff] }
  0xd8   : > { %642 = vmatprep.subr.mxu0 %v495_v56  ;;  %715 = vmatprep.subr.mxu1 %v557_v57  ;;  %v492_v62 = vld [vmem:[#allocation3 + $0x20] sm:$0xff]  ;;  %v554_v63 = vld [vmem:[#allocation3 + $0x210] sm:$0xff]  ;;  %v491_v3 = vld [vmem:[#allocation3 + $0x18] sm:$0xff] }
  0xd9   : > { %643 = vmatpush1.msra.mxu0 %v494_v58  ;;  %716 = vmatpush1.msra.mxu1 %v556_v59  ;;  %v489_v16 = vld [vmem:[#allocation3 + $0x8] sm:$0xff]  ;;  %v615_v17 = vld [vmem:[#allocation3 + $0x3f8] sm:$0xff]  ;;  %v488_v22 = vld [vmem:[#allocation3] sm:$0xff] }
  0xda   : > { %644 = vmatprep.subr.mxu0 %v493_v60  ;;  %717 = vmatprep.subr.mxu1 %v555_v61  ;;  %v614_v23 = vld [vmem:[#allocation3 + $0x3f0] sm:$0xff]  ;;  %v612_v27 = vld [vmem:[#allocation3 + $0x3e0] sm:$0xff]  ;;  %v599_v53 = vld [vmem:[#allocation3 + $0x378] sm:$0xff] }
  0xdb   : > { %355 = vadd.xlane.f32.xlu1 %v354_v10  ;;  %352 = vadd.xlane.f32.xlu0 %v351_v11  ;;  %v490_v10 = vld [vmem:[#allocation3 + $0x10] sm:$0xff]  ;;  %v552_v11 = vld [vmem:[#allocation3 + $0x200] sm:$0xff]  ;;  %v535_v56 = vld [vmem:[#allocation3 + $0x178] sm:$0xff] }
  0xdc   : > { %645 = vmatpush1.msra.mxu0 %v492_v62  ;;  %718 = vmatpush1.msra.mxu1 %v554_v63  ;;  %v550_v26 = vld [vmem:[#allocation3 + $0x1f0] sm:$0xff]  ;;  %v536_v54 = vld [vmem:[#allocation3 + $0x180] sm:$0xff]  ;;  %v597_v57 = vld [vmem:[#allocation3 + $0x368] sm:$0xff] }
  0xdd   : > { %646 = vmatprep.subr.mxu0 %v491_v3  ;;  %719 = vmatprep.subr.mxu1 %v553_v7  ;;  %v598_v55 = vld [vmem:[#allocation3 + $0x370] sm:$0xff]  ;;  %v596_v59 = vld [vmem:[#allocation3 + $0x360] sm:$0xff]  ;;  %v533_v60 = vld [vmem:[#allocation3 + $0x168] sm:$0xff] }
  0xde   : > { %647 = vmatpush1.msra.mxu0 %v490_v10  ;;  %720 = vmatpush1.msra.mxu1 %v552_v11  ;;  %v534_v58 = vld [vmem:[#allocation3 + $0x170] sm:$0xff]  ;;  %v595_v61 = vld [vmem:[#allocation3 + $0x358] sm:$0xff]  ;;  %v532_v62 = vld [vmem:[#allocation3 + $0x160] sm:$0xff] }
  0xdf   : > { %361 = vadd.xlane.f32.xlu1 %v360_v24  ;;  %358 = vadd.xlane.f32.xlu0 %v357_v25  ;;  %v551_v24 = vld [vmem:[#allocation3 + $0x1f8] sm:$0xff]  ;;  %v613_v25 = vld [vmem:[#allocation3 + $0x3e8] sm:$0xff]  ;;  %v594_v63 = vld [vmem:[#allocation3 + $0x350] sm:$0xff] }
  0xe0   : > { %648 = vmatprep.subr.mxu0 %v489_v16  ;;  %721 = vmatprep.subr.mxu1 %v615_v17  ;;  %v531_v3 = vld [vmem:[#allocation3 + $0x158] sm:$0xff]  ;;  %v593_v7 = vld [vmem:[#allocation3 + $0x348] sm:$0xff]  ;;  %v530_v10 = vld [vmem:[#allocation3 + $0x150] sm:$0xff] }
  0xe1   : > { %649 = vmatpush1.msra.mxu0 %v488_v22  ;;  %722 = vmatpush2.msra.mxu1 %v614_v23  ;;  %v592_v11 = vld [vmem:[#allocation3 + $0x340] sm:$0xff]  ;;  %v529_v16 = vld [vmem:[#allocation3 + $0x148] sm:$0xff]  ;;  %v591_v17 = vld [vmem:[#allocation3 + $0x338] sm:$0xff] }
  0xe2   : > { %650 = vmatprep.subr.mxu0 %v551_v24  ;;  %723 = vmatprep.subr.mxu1 %v613_v25  ;;  %v528_v22 = vld [vmem:[#allocation3 + $0x140] sm:$0xff]  ;;  %v590_v23 = vld [vmem:[#allocation3 + $0x330] sm:$0xff]  ;;  %v527_v24 = vld [vmem:[#allocation3 + $0x138] sm:$0xff] }
  0xe3   : > { %367 = vadd.xlane.f32.xlu1 %v366_v30  ;;  %364 = vadd.xlane.f32.xlu0 %v363_v31  ;;  %v548_v30 = vld [vmem:[#allocation3 + $0x1e0] sm:$0xff]  ;;  %v610_v31 = vld [vmem:[#allocation3 + $0x3d0] sm:$0xff]  ;;  %v589_v25 = vld [vmem:[#allocation3 + $0x328] sm:$0xff] }
  0xe4   : > { %651 = vmatpush2.msra.mxu0 %v550_v26  ;;  %724 = vmatpush2.msra.mxu1 %v612_v27  ;;  %v526_v26 = vld [vmem:[#allocation3 + $0x130] sm:$0xff]  ;;  %v588_v27 = vld [vmem:[#allocation3 + $0x320] sm:$0xff] }
  0xe5   : > { %652 = vmatprep.subr.mxu0 %v549_v28  ;;  %725 = vmatprep.subr.mxu1 %v611_v29  ;;  %v525_v28 = vld [vmem:[#allocation3 + $0x128] sm:$0xff]  ;;  %v587_v29 = vld [vmem:[#allocation3 + $0x318] sm:$0xff] }
  0xe6   : > { %653 = vmatpush2.msra.mxu0 %v548_v30  ;;  %726 = vmatpush2.msra.mxu1 %v610_v31  ;;  %v524_v30 = vld [vmem:[#allocation3 + $0x120] sm:$0xff]  ;;  %v586_v31 = vld [vmem:[#allocation3 + $0x310] sm:$0xff] }
  0xe7   : > { %654 = vmatprep.subr.mxu0 %v547_v32  ;;  %727 = vmatprep.subr.mxu1 %v609_v33  ;;  %v523_v32 = vld [vmem:[#allocation3 + $0x118] sm:$0xff]  ;;  %v585_v33 = vld [vmem:[#allocation3 + $0x308] sm:$0xff] }
  0xe8   : > { %655 = vmatpush2.msra.mxu0 %v546_v34  ;;  %728 = vmatpush2.msra.mxu1 %v608_v35  ;;  %v522_v34 = vld [vmem:[#allocation3 + $0x110] sm:$0xff]  ;;  %v584_v35 = vld [vmem:[#allocation3 + $0x300] sm:$0xff] }
  0xe9   : > { %656 = vmatprep.subr.mxu0 %v545_v36  ;;  %729 = vmatprep.subr.mxu1 %v607_v37  ;;  %v521_v36 = vld [vmem:[#allocation3 + $0x108] sm:$0xff]  ;;  %v520_v37 = vld [vmem:[#allocation3 + $0x100] sm:$0xff] }
  0xea   : > { %657 = vmatpush2.msra.mxu0 %v544_v38  ;;  %730 = vmatpush2.msra.mxu1 %v606_v39 }
  0xeb   : > { %658 = vmatprep.subr.mxu0 %v543_v40  ;;  %731 = vmatprep.subr.mxu1 %v605_v41 }
  0xec   : > { %659 = vmatpush2.msra.mxu0 %v542_v42  ;;  %732 = vmatpush2.msra.mxu1 %v604_v43 }
  0xed   : > { %660 = vmatprep.subr.mxu0 %v541_v44  ;;  %733 = vmatprep.subr.mxu1 %v603_v45 }
  0xee   : > { %661 = vmatpush2.msra.mxu0 %v540_v46  ;;  %734 = vmatpush2.msra.mxu1 %v602_v47 }
  0xef   : > { %662 = vmatprep.subr.mxu0 %v539_v48  ;;  %735 = vmatprep.subr.mxu1 %v601_v49 }
  0xf0   : > { %663 = vmatpush2.msra.mxu0 %v538_v50  ;;  %736 = vmatpush2.msra.mxu1 %v600_v51 }
  0xf1   : > { %664 = vmatprep.subr.mxu0 %v537_v52  ;;  %737 = vmatprep.subr.mxu1 %v599_v53 }
  0xf2   : > { %665 = vmatpush2.msra.mxu0 %v536_v54  ;;  %738 = vmatpush2.msra.mxu1 %v598_v55 }
  0xf3   : > { %666 = vmatprep.subr.mxu0 %v535_v56  ;;  %739 = vmatprep.subr.mxu1 %v597_v57 }
  0xf4   : > { %667 = vmatpush2.msra.mxu0 %v534_v58  ;;  %740 = vmatpush2.msra.mxu1 %v596_v59 }
  0xf5   : > { %668 = vmatprep.subr.mxu0 %v533_v60  ;;  %741 = vmatprep.subr.mxu1 %v595_v61 }
  0xf6   : > { %669 = vmatpush2.msra.mxu0 %v532_v62  ;;  %742 = vmatpush2.msra.mxu1 %v594_v63 }
  0xf7   : > { %670 = vmatprep.subr.mxu0 %v531_v3  ;;  %743 = vmatprep.subr.mxu1 %v593_v7 }
  0xf8   : > { %671 = vmatpush2.msra.mxu0 %v530_v10  ;;  %744 = vmatpush2.msra.mxu1 %v592_v11 }
  0xf9   : > { %672 = vmatprep.subr.mxu0 %v529_v16  ;;  %745 = vmatprep.subr.mxu1 %v591_v17 }
  0xfa   : > { %673 = vmatpush2.msra.mxu0 %v528_v22  ;;  %746 = vmatpush2.msra.mxu1 %v590_v23 }
  0xfb   : > { %674 = vmatprep.subr.mxu0 %v527_v24  ;;  %747 = vmatprep.subr.mxu1 %v589_v25 }
  0xfc   : > { %675 = vmatpush2.msra.mxu0 %v526_v26  ;;  %748 = vmatpush2.msra.mxu1 %v588_v27 }
  0xfd   : > { %676 = vmatprep.subr.mxu0 %v525_v28  ;;  %749 = vmatprep.subr.mxu1 %v587_v29 }
  0xfe   : > { %677 = vmatpush2.msra.mxu0 %v524_v30  ;;  %750 = vmatpush2.msra.mxu1 %v586_v31 }
  0xff   : > { %678 = vmatprep.subr.mxu0 %v523_v32  ;;  %751 = vmatprep.subr.mxu1 %v585_v33 }
 0x100   : > { %679 = vmatpush2.msra.mxu0 %v522_v34  ;;  %752 = vmatpush2.msra.mxu1 %v584_v35 }
 0x101   : > { %680 = vmatprep.subr.mxu0 %v521_v36 }
 0x102   : > { %681 = vmatpush2.msra.mxu0 %v520_v37 }
 0x160   : > { %v350_v38 = vpop.xlane.xlu1 %349  ;;  %v347_v39 = vpop.xlane.xlu0 %346 }
 0x161   : > { %v370_v40 = vmul.f32 0.5, %v350_v38  ;;  %v369_v41 = vmul.f32 0.5, %v347_v39 }
 0x163   : > { %927 = vtanh.f32 %v370_v40 }
 0x164   : > { %929 = vtanh.f32 %v369_v41  ;;  %v356_v42 = vpop.xlane.xlu1 %355  ;;  %v353_v43 = vpop.xlane.xlu0 %352 }
 0x165   : > { %v372_v44 = vmul.f32 0.5, %v356_v42  ;;  %v371_v45 = vmul.f32 0.5, %v353_v43 }
 0x167   : > { %931 = vtanh.f32 %v372_v44 }
 0x168   : > { %933 = vtanh.f32 %v371_v45  ;;  %v362_v46 = vpop.xlane.xlu1 %361  ;;  %v359_v47 = vpop.xlane.xlu0 %358 }
 0x169   : > { %v374_v48 = vmul.f32 0.5, %v362_v46  ;;  %v373_v49 = vmul.f32 0.5, %v359_v47 }
 0x16b   : > { %935 = vtanh.f32 %v374_v48 }
 0x16c   : > { %937 = vtanh.f32 %v373_v49  ;;  %v368_v50 = vpop.xlane.xlu1 %367  ;;  %v365_v51 = vpop.xlane.xlu0 %364 }
 0x16d   : > { %v376_v52 = vmul.f32 0.5, %v368_v50  ;;  %v375_v53 = vmul.f32 0.5, %v365_v51 }
 0x16f   : > { %939 = vtanh.f32 %v376_v52 }
 0x170   : > { %v928_v54 = vpop.eup %927  ;;  %941 = vtanh.f32 %v375_v53 }
 0x171   : > { %v930_v55 = vpop.eup %929  ;;  %v386_v56 = vadd.f32 1.0, %v928_v54 }
 0x172   : > { %v385_v57 = vadd.f32 1.0, %v930_v55 }
 0x173   : > { %v394_v58 = vmul.f32 0.5, %v386_v56 }
 0x174   : > { %v932_v59 = vpop.eup %931  ;;  %v393_v60 = vmul.f32 0.5, %v385_v57 }
 0x175   : > { %v934_v61 = vpop.eup %933  ;;  %v1164_v62 = vmul.f32 %v394_v58, %v1061_v5  ;;  %v1167_v63 = vmul.f32 %v394_v58, %v1063_v6  ;;  %v388_v3 = vadd.f32 1.0, %v932_v59 }
 0x176   : > { %v1170_v7 = vmul.f32 %v393_v60, %v1051_v0  ;;  %v1173_v10 = vmul.f32 %v393_v60, %v1053_v1  ;;  %v387_v11 = vadd.f32 1.0, %v934_v61 }
 0x177   : > { %v396_v16 = vmul.f32 0.5, %v388_v3 }
 0x178   : > { %v936_v17 = vpop.eup %935  ;;  %v395_v22 = vmul.f32 0.5, %v387_v11  ;;  %v433_v24 = vadd.f32 %v1164_v62, %v1170_v7  ;;  %v446_v5 = vadd.f32 %v1167_v63, %v1173_v10 }
 0x179   : > { %v938_v23 = vpop.eup %937  ;;  %v1180_v6 = vmul.f32 %v396_v16, %v1067_v8  ;;  %v390_v25 = vadd.f32 1.0, %v936_v17  ;;  %v1183_v0 = vmul.f32 %v396_v16, %v1069_v9 }
 0x17a   : > { %v1186_v1 = vmul.f32 %v395_v22, %v1055_v2  ;;  %v1189_v26 = vmul.f32 %v395_v22, %v1059_v4  ;;  %v389_v27 = vadd.f32 1.0, %v938_v23 }
 0x17b   : > { %v398_v28 = vmul.f32 0.5, %v390_v25  ;;  %v463_v30 = vmax.f32 %v1164_v62, %v1180_v6  ;;  %v476_v34 = vmax.f32 %v1167_v63, %v1183_v0 }
 0x17c   : > { %v940_v29 = vpop.eup %939  ;;  %v434_v31 = vadd.f32 %v433_v24, %v1186_v1  ;;  %v447_v8 = vadd.f32 %v446_v5, %v1189_v26  ;;  %v397_v33 = vmul.f32 0.5, %v389_v27  ;;  %v462_v38 = vmax.f32 %v1170_v7, %v1186_v1 }
 0x17d   : > { %v942_v32 = vpop.eup %941  ;;  %v1196_v9 = vmul.f32 %v398_v28, %v1079_v14  ;;  %v1199_v2 = vmul.f32 %v398_v28, %v1081_v15  ;;  %v392_v4 = vadd.f32 1.0, %v940_v29  ;;  %v475_v40 = vmax.f32 %v1173_v10, %v1189_v26 }
 0x17e   : > { %v435_v35 = vadd.f32 %v434_v31, %v1180_v6  ;;  %v448_v36 = vadd.f32 %v447_v8, %v1183_v0  ;;  %v391_v37 = vadd.f32 1.0, %v942_v32  ;;  %v1208_v39 = vmul.f32 %v397_v33, %v1075_v12 }
 0x17f   : > { %v1211_v14 = vmul.f32 %v397_v33, %v1077_v13  ;;  %v400_v15 = vmul.f32 0.5, %v392_v4  ;;  %v465_v41 = vmax.f32 %v463_v30, %v1196_v9  ;;  %v478_v43 = vmax.f32 %v476_v34, %v1199_v2 }
 0x180   : > { %v399_v42 = vmul.f32 0.5, %v391_v37  ;;  %v436_v44 = vadd.f32 %v435_v35, %v1208_v39  ;;  %v464_v46 = vmax.f32 %v462_v38, %v1208_v39  ;;  %v617_v38 = vstv %s616_s17 }
 0x181   : > { %v449_v45 = vadd.f32 %v448_v36, %v1211_v14  ;;  %v1221_v12 = vmul.f32 %v400_v15, %v1091_v20  ;;  %v1224_v13 = vmul.f32 %v400_v15, %v1093_v21  ;;  %v477_v49 = vmax.f32 %v475_v40, %v1211_v14 }
 0x182   : > { %v1227_v47 = vmul.f32 %v399_v42, %v1087_v18  ;;  %v1230_v48 = vmul.f32 %v399_v42, %v1089_v19  ;;  %v437_v51 = vadd.f32 %v436_v44, %v1196_v9 }
 0x183   : > { %v467_v50 = vmax.f32 %v465_v41, %v1221_v12  ;;  %v450_v52 = vadd.f32 %v449_v45, %v1199_v2  ;;  %v480_v21 = vmax.f32 %v478_v43, %v1224_v13 }
 0x184   : > { %v466_v20 = vmax.f32 %v464_v46, %v1227_v47  ;;  %v479_v53 = vmax.f32 %v477_v49, %v1230_v48  ;;  %v438_v18 = vadd.f32 %v437_v51, %v1227_v47  ;;  %v784_v51 = vlaneseq }
 0x185   : > { %v451_v54 = vadd.f32 %v450_v52, %v1230_v48 }
 0x186   : > { %v481_v19 = vmax.f32 %v479_v53, %v480_v21  ;;  %v468_v55 = vmax.f32 %v466_v20, %v467_v50  ;;  %v439_v57 = vadd.f32 %v438_v18, %v1221_v12  ;;  %v785_v52 = vshrl.u32 %v784_v51, 7 }
 0x187   : > { %v452_v56 = vadd.f32 %v451_v54, %v1224_v13 }
 0x188   : > { %v482_v58 = vrot.slane %v481_v19, 4  ;;  %v469_v59 = vrot.slane %v468_v55, 4  ;;  %v440_v61 = vrot.slane %v439_v57, 4  ;;  %v786_v21 = vsub.s32 0, %v785_v52 }
 0x189   : > { %v453_v60 = vrot.slane %v452_v56, 4 }
 0x18a   : > { %v483_v3 = vmax.f32 %v481_v19, %v482_v58  ;;  %v470_v11 = vmax.f32 %v468_v55, %v469_v59  ;;  %v441_v17 = vadd.f32 %v440_v61, %v439_v57 }
 0x18b   : > { %v454_v16 = vadd.f32 %v453_v60, %v452_v56 }
 0x18c   : > { %v484_v22 = vrot.slane %v483_v3, 2  ;;  %v471_v23 = vrot.slane %v470_v11, 2  ;;  %v442_v5 = vrot.slane %v441_v17, 2 }
 0x18d   : > { %v455_v24 = vrot.slane %v454_v16, 2 }
 0x18e   : > { %v485_v25 = vmax.f32 %v483_v3, %v484_v22  ;;  %v472_v27 = vmax.f32 %v470_v11, %v471_v23  ;;  %v443_v29 = vadd.f32 %v442_v5, %v441_v17 }
 0x18f   : > { %v456_v28 = vadd.f32 %v455_v24, %v454_v16 }
 0x190   : > { %v486_v30 = vrot.slane %v485_v25, 1  ;;  %v473_v31 = vrot.slane %v472_v27, 1  ;;  %v444_v32 = vrot.slane %v443_v29, 1 }
 0x191   : > { %v457_v8 = vrot.slane %v456_v28, 1 }
 0x192   : > { %v487_v33 = vmax.f32 %v485_v25, %v486_v30  ;;  %v474_v4 = vmax.f32 %v472_v27, %v473_v31  ;;  %v445_v35 = vadd.f32 %v444_v32, %v443_v29 }
 0x193   : > { %v458_v34 = vadd.f32 %v457_v8, %v456_v28 }
 0x194   : > { %753 = vmatprep.mubr.f32.mxu1 %v487_v33  ;;  %v460_v37 = vmul.f32 0.015625, %v445_v35 }
 0x195   : > { %754 = vmatmul.mubr.f32.vlgmr.msra.gmra.mxu1 %v474_v4  ;;  %v461_v36 = vmul.f32 0.015625, %v458_v34 }
 0x197   : > { %682 = vmatprep.mubr.f32.mxu0 %v461_v36 }
 0x198   : > { %683 = vmatmul.mubr.f32.vlgmr.msra.gmra.mxu0 %v460_v37 }
 0x255   : > { %v755_v15 = vpop.f32.mrf.mxu1 }
 0x257   : > { %v757_v45 = vpop.f32.mrf.mxu1 }
 0x258   : > { %v684_v40 = vpop.f32.mrf.mxu0 }
 0x259   : > { %v685_v41 = vadd.f32 %v684_v40, %v617_v38 }
 0x25a   : > { %v686_v42 = vpop.f32.mrf.mxu0 }
 0x25b   : > { %v756_v43 = vadd.f32 %v755_v15, %v685_v41  ;;  %v687_v44 = vadd.f32 %v686_v42, %v617_v38 }
 0x25d   : > { %v760_v46 = vmul.f32 0.5, %v756_v43  ;;  %v758_v49 = vadd.f32 %v757_v45, %v687_v44 }
 0x25f   : > { %943 = vtanh.f32 %v760_v46  ;;  %v761_v50 = vmul.f32 0.5, %v758_v49 }
 0x261   : > { %945 = vtanh.f32 %v761_v50 }
 0x26c   : > { %v944_v20 = vpop.eup %943 }
 0x26d   : > { %v764_v53 = vadd.f32 1.0, %v944_v20 }
 0x26e   : > { %v946_v18 = vpop.eup %945 }
 0x26f   : > { %v766_v54 = vmul.f32 0.5, %v764_v53  ;;  %v765_v19 = vadd.f32 1.0, %v946_v18 }
 0x271   : > { %v787_v55 = vrot.slane %v766_v54, %v786_v21  ;;  %v767_v56 = vmul.f32 0.5, %v765_v19 }
 0x273   : > { %v792_v57 = vmul.f32 %v787_v55, %v1170_v7  ;;  %v794_v58 = vmul.f32 %v787_v55, %v1164_v62  ;;  %v796_v59 = vmul.f32 %v787_v55, %v1186_v1  ;;  %v798_v60 = vmul.f32 %v787_v55, %v1180_v6 }
 0x274   : > { %v800_v61 = vmul.f32 %v787_v55, %v1208_v39  ;;  %v802_v3 = vmul.f32 %v787_v55, %v1196_v9  ;;  %v804_v11 = vmul.f32 %v787_v55, %v1227_v47  ;;  %v806_v16 = vmul.f32 %v787_v55, %v1221_v12 }
 0x275   : > { %808 = vst [vmem:[%s1248_s22] sm:$0xff] %v792_v57  ;;  %810 = vst [vmem:[%s1248_s22 + $0x10] sm:$0xff] %v794_v58  ;;  %v791_v62 = vrot.slane %v767_v56, %v786_v21 }
 0x276   : > { %812 = vst [vmem:[%s1248_s22 + $0x20] sm:$0xff] %v796_v59  ;;  %814 = vst [vmem:[%s1248_s22 + $0x30] sm:$0xff] %v798_v60 }
 0x277   : > { %816 = vst [vmem:[%s1248_s22 + $0x40] sm:$0xff] %v800_v61  ;;  %818 = vst [vmem:[%s1248_s22 + $0x50] sm:$0xff] %v802_v3  ;;  %v793_v7 = vmul.f32 %v791_v62, %v1173_v10  ;;  %v795_v6 = vmul.f32 %v791_v62, %v1167_v63  ;;  %v797_v1 = vmul.f32 %v791_v62, %v1189_v26 }
 0x278   : > { %820 = vst [vmem:[%s1248_s22 + $0x60] sm:$0xff] %v804_v11  ;;  %822 = vst [vmem:[%s1248_s22 + $0x70] sm:$0xff] %v806_v16  ;;  %v799_v9 = vmul.f32 %v791_v62, %v1183_v0  ;;  %v801_v39 = vmul.f32 %v791_v62, %v1211_v14  ;;  %v803_v12 = vmul.f32 %v791_v62, %v1199_v2 }
 0x279   : > { %v805_v47 = vmul.f32 %v791_v62, %v1230_v48  ;;  %v807_v17 = vmul.f32 %v791_v62, %v1224_v13  ;;  %809 = vst [vmem:[%s1248_s22 + $0x8] sm:$0xff] %v793_v7  ;;  %811 = vst [vmem:[%s1248_s22 + $0x18] sm:$0xff] %v795_v6 }
 0x27a   : > { %813 = vst [vmem:[%s1248_s22 + $0x28] sm:$0xff] %v797_v1  ;;  %815 = vst [vmem:[%s1248_s22 + $0x38] sm:$0xff] %v799_v9 }
 0x27b   : > { %817 = vst [vmem:[%s1248_s22 + $0x48] sm:$0xff] %v801_v39  ;;  %819 = vst [vmem:[%s1248_s22 + $0x58] sm:$0xff] %v803_v12 }
 0x27c   : > { %821 = vst [vmem:[%s1248_s22 + $0x68] sm:$0xff] %v805_v47  ;;  %823 = vst [vmem:[%s1248_s22 + $0x78] sm:$0xff] %v807_v17 }
 0x27d PF: > { %s17_s20 = sadd.s32 1, %s983_s20  }
 0x27e   : > { %p14_p1 = scmp.ge.s32.totalorder %s17_s20, 4  }
 0x280   :  { %16 = sbr.rel (!%p14_p1) target bundleno = 3 (0x3), region = 75 }
 0x285   :  { %845 = vsyncpa [#allocation4], 1 }
 0x286   :  { %847 = vsyncpa [#allocation4 + $0x1], 1 }

</bundles_post_ra>
